<compile_context>
chip_gen: v7x
topology: tpu7x:2x2x1
jax: 0.10.0
libtpu: 0.0.40
codegen_flags: <defaults>
</compile_context>

<pallas_src>
import functools

import jax
import jax.numpy as jnp
from jax.experimental import pallas as pl
from jax.experimental.pallas import tpu as pltpu


# -----------------------------------------------------------------------------
# Helpers
# -----------------------------------------------------------------------------
def _round_up(x, m):
    return (x + m - 1) // m * m


def _vmem_capacity_bytes():
    try:
        return int(pltpu.get_tpu_info().vmem_capacity_bytes)
    except Exception:
        return 64 * 1024 * 1024          # safe floor (v7x per-TC VMEM)


def _temp_bytes_per_lane(KA, KRp, hidden):
    # wa/wr weight slabs + cols (flow 2ch + image 1ch) + hidden activations +
    # assorted (1, TQ) rows (sublane padded).  Conservative.
    return 4 * (2 * KA + 5 * KRp + hidden + 96)


def _choose_query_tile(npad, KA, KRp, hidden, cap):
    """Largest lane-dense query tile (multiple of 128) dividing npad whose
    in-kernel temporaries fit comfortably in VMEM."""
    budget = cap // 3
    per_lane = _temp_bytes_per_lane(KA, KRp, hidden)
    cands = {t for t in (128, 256, 384, 512, 768, 1024, 1536, 2048) if npad % t == 0}
    if npad <= 4096:
        cands.add(npad)                  # whole (padded) image in one tile when small
    best = 128
    for t in sorted(cands):
        if t * per_lane <= budget:
            best = t
    return best


def _vmem_limit_bytes(TQ, KA, KRp, hidden, interp_bytes, cap):
    lane_ka = _round_up(KA, 128)
    blocks = 2 * (4 * 2 * KRp * lane_ka            # resident agg source (f32), dbl-buffered
                  + interp_bytes * KRp * lane_ka   # resident moving source
                  + 4 * 8 * TQ * 6)                # fixed/pwarp/base + 3 output tiles
    temps = TQ * _temp_bytes_per_lane(KA, KRp, hidden)
    est = blocks + temps + (1 << 20)
    # v5e/v6e (128 MiB) get headroom above 64 MiB when needed; v7x stays ~10%
    # under its 64 MiB ceiling.
    return int(min(max(2 * est, 32 * 1024 * 1024), int(cap * 0.9)))


def _pack_stem_params(w1, b1, w2, b2, hidden):
    """Pack the synthetic NIL-stem parameters into one (hidden, 8) f32 array."""
    p = jnp.zeros((hidden, 8), jnp.float32)
    p = p.at[:, 0].set(w1[0])          # fixed  -> hidden
    p = p.at[:, 1].set(w1[1])          # moving -> hidden
    p = p.at[:, 2].set(b1)
    p = p.at[:, 3].set(w2[:, 0])       # hidden -> flow dH
    p = p.at[:, 4].set(w2[:, 1])       # hidden -> flow dW
    p = p.at[:, 5].set(b2[0])
    p = p.at[:, 6].set(b2[1])
    return p


# -----------------------------------------------------------------------------
# In-kernel bilinear warp:
#   one MXU matmul contracts over the KA axis (the larger of H, W), then a
#   cheap VPU-multiply + sublane reduce over the (8-padded) KRp axis.
#   Weights use the tent formulation; coordinates are pre-clamped so padded
#   rows get exactly zero weight.
# -----------------------------------------------------------------------------
def _bilinear_warp(src, s_a, s_r, *, C, KA, KRp):
    """src: (C*KRp, KA), channel c in rows [c*KRp, (c+1)*KRp).
    s_a, s_r: (1, TQ) f32 sample coordinates along the KA / KRp axes (clamped
    to the valid unpadded range).  Returns C arrays of shape (1, TQ), f32."""
    TQ = s_a.shape[-1]

    ia = jax.lax.broadcasted_iota(jnp.int32, (KA, TQ), 0).astype(jnp.float32)
    wa = jnp.maximum(1.0 - jnp.abs(ia - s_a), 0.0)            # (KA, TQ) tent
    wa = wa.astype(src.dtype)                                  # bf16 only for the image warp

    cols = jnp.dot(src, wa, preferred_element_type=jnp.float32)  # (C*KRp, TQ), f32 acc

    ir = jax.lax.broadcasted_iota(jnp.int32, (KRp, TQ), 0).astype(jnp.float32)
    wr = jnp.maximum(1.0 - jnp.abs(ir - s_r), 0.0)             # (KRp, TQ); padded rows = 0

    return [jnp.sum(wr * cols[c * KRp:(c + 1) * KRp, :], axis=0, keepdims=True)
            for c in range(C)]


# -----------------------------------------------------------------------------
# Fused per-cascade kernel body:
#   flow   = stem(fixed, prev_warped) * flow_multiplier
#   agg    = warp(prev_agg, flow) + flow        (skipped for cascade 0)
#   warped = warp(moving, agg)
# -----------------------------------------------------------------------------
def _cascade_body(params_ref, base_ref, fixed_ref, pwarp_ref, agg_src_ref,
                  mov_src_ref, flow_out_ref, agg_out_ref, warped_out_ref,
                  *, H, W, KA, KRp, swap, flow_mult, first):
    f32 = jnp.float32

    # ---- Stem: pointwise 2-layer MLP, query pixels in lanes (VPU FMAs) ------
    xf = fixed_ref[0].astype(f32)                   # (1, TQ)
    xm = pwarp_ref[0].astype(f32)                   # (1, TQ)
    P = params_ref[...]                             # (hidden, 8)
    w1f, w1m, b1 = P[:, 0:1], P[:, 1:2], P[:, 2:3]
    w2h, w2w = P[:, 3:4], P[:, 4:5]
    b2h, b2w = P[0:1, 5:6], P[0:1, 6:7]

    h = jnp.maximum(w1f * xf + w1m * xm + b1, 0.0)                        # (hidden, TQ)
    flow_h = (jnp.sum(w2h * h, axis=0, keepdims=True) + b2h) * flow_mult  # (1, TQ)
    flow_w = (jnp.sum(w2w * h, axis=0, keepdims=True) + b2w) * flow_mult  # (1, TQ)

    # Exact integer-derived identity grid (streamed in, not rebuilt in-kernel).
    r_base = base_ref[0:1, :]                       # (1, TQ) row coordinate
    c_base = base_ref[1:2, :]                       # (1, TQ) col coordinate

    def coords(d_h, d_w):
        xs = jnp.clip(r_base + d_h, 0.0, float(H - 1))
        ys = jnp.clip(c_base + d_w, 0.0, float(W - 1))
        return (xs, ys) if swap else (ys, xs)       # (MXU axis, reduce axis)

    if first:
        # Cascade 0: agg_flow = flow exactly (reference: no warp applied).
        agg_h, agg_w = flow_h, flow_w
    else:
        # agg = warp(prev_agg, flow) + flow ; prev_agg source stays f32.
        s_a, s_r = coords(flow_h, flow_w)
        wa_h, wa_w = _bilinear_warp(agg_src_ref[0], s_a, s_r, C=2, KA=KA, KRp=KRp)
        agg_h = wa_h + flow_h
        agg_w = wa_w + flow_w

    # warped = warp(moving, agg) ; moving source pre-cast to bf16 in wrapper.
    s_a, s_r = coords(agg_h, agg_w)
    (warped,) = _bilinear_warp(mov_src_ref[0], s_a, s_r, C=1, KA=KA, KRp=KRp)

    # Coalesced, lane-dense stores (one (2, TQ) store per flow tensor).
    flow_out_ref[0] = jnp.concatenate([flow_h, flow_w], axis=0)
    agg_out_ref[0] = jnp.concatenate([agg_h, agg_w], axis=0)
    warped_out_ref[0] = warped


def _cascade_kernel_first(params_ref, base_ref, fixed_ref, pwarp_ref,
                          mov_src_ref, flow_out_ref, agg_out_ref,
                          warped_out_ref, **kw):
    _cascade_body(params_ref, base_ref, fixed_ref, pwarp_ref, None, mov_src_ref,
                  flow_out_ref, agg_out_ref, warped_out_ref, first=True, **kw)


def _cascade_kernel_rest(params_ref, base_ref, fixed_ref, pwarp_ref,
                         agg_src_ref, mov_src_ref, flow_out_ref, agg_out_ref,
                         warped_out_ref, **kw):
    _cascade_body(params_ref, base_ref, fixed_ref, pwarp_ref, agg_src_ref,
                  mov_src_ref, flow_out_ref, agg_out_ref, warped_out_ref,
                  first=False, **kw)


def cascade_forward(params, grid_base, fixed, prev_warped, agg_src, mov_src, *,
                    H, W, KA, KRp, swap, TQ, flow_mult, vmem_limit, first):
    """One fused cascade step.
    fixed / prev_warped: (B, 1, Npad); grid_base: (2, Npad);
    agg_src: (B, 2*KRp, KA) f32 (None when first); mov_src: (B, KRp, KA) bf16;
    params: (hidden, 8).
    Returns flow (B, 2, Npad), agg_flow (B, 2, Npad), warped (B, 1, Npad)."""
    B, _, Npad = fixed.shape
    hidden = params.shape[0]
    NQ = Npad // TQ

    kw = dict(H=H, W=W, KA=KA, KRp=KRp, swap=swap, flow_mult=float(flow_mult))

    in_specs = [
        pl.BlockSpec((hidden, 8), lambda b, q: (0, 0)),      # stem params (resident)
        pl.BlockSpec((2, TQ), lambda b, q: (0, q)),          # identity grid tile
        pl.BlockSpec((1, 1, TQ), lambda b, q: (b, 0, q)),    # fixed tile
        pl.BlockSpec((1, 1, TQ), lambda b, q: (b, 0, q)),    # prev warped tile
    ]
    args = [params, grid_base, fixed, prev_warped]

    if first:
        kernel = functools.partial(_cascade_kernel_first, **kw)
    else:
        kernel = functools.partial(_cascade_kernel_rest, **kw)
        in_specs.append(pl.BlockSpec((1, 2 * KRp, KA), lambda b, q: (b, 0, 0)))  # agg src
        args.append(agg_src)

    in_specs.append(pl.BlockSpec((1, KRp, KA), lambda b, q: (b, 0, 0)))          # moving src
    args.append(mov_src)

    # TODO(synk): with grid=(B, NQ) the query axis is innermost so warp sources
    # stay resident across q; on v7x (2 TCs) verify megacore sharding picks the
    # q axis when B == 1.
    return pl.pallas_call(
        kernel,
        out_shape=(
            jax.ShapeDtypeStruct((B, 2, Npad), jnp.float32),   # flow
            jax.ShapeDtypeStruct((B, 2, Npad), jnp.float32),   # agg_flow
            jax.ShapeDtypeStruct((B, 1, Npad), jnp.float32),   # warped
        ),
        grid=(B, NQ),
        in_specs=in_specs,
        out_specs=[
            pl.BlockSpec((1, 2, TQ), lambda b, q: (b, 0, q)),
            pl.BlockSpec((1, 2, TQ), lambda b, q: (b, 0, q)),
            pl.BlockSpec((1, 1, TQ), lambda b, q: (b, 0, q)),
        ],
        compiler_params=pltpu.CompilerParams(
            dimension_semantics=("parallel", "parallel"),
            vmem_limit_bytes=vmem_limit,
        ),
    )(*args)


# -----------------------------------------------------------------------------
# RecursiveCascadeNetwork (forward only)
# -----------------------------------------------------------------------------
class RecursiveCascadeNetwork:
    def __init__(self, n_cascades, im_size, network="NIL", hidden=32, seed=0,
                 interp_dtype=jnp.bfloat16):
        assert network == "NIL", "only NIL stems are implemented"
        self.det_factor = 0.1
        self.ortho_factor = 0.1
        self.reg_factor = 1.0
        self.gamma = 0.15
        self.lamb = 0.1
        self.beta = 0.1
        self.network = network
        self.n_cascades = n_cascades
        self.im_size = tuple(im_size)
        self.dim = len(im_size)
        assert self.dim == 2  # TODO(synk): 3-D (x, y, z) variant of the warp kernel.
        self.hidden = hidden
        self.flow_mult = 1.0 / n_cascades
        self.interp_dtype = interp_dtype

        H, W = self.im_size
        self.N = H * W
        self.Npad = _round_up(self.N, 128)      # never let temporaries scale with raw N

        # MXU contracts over the larger image axis; the reduce axis is padded
        # to a multiple of 8 sublanes so per-channel slices stay tile-aligned.
        self.swap = H > W
        self.KA = H if self.swap else W
        self.KR = W if self.swap else H
        self.KRp = _round_up(self.KR, 8)

        cap = _vmem_capacity_bytes()
        self.TQ = _choose_query_tile(self.Npad, self.KA, self.KRp, hidden, cap)
        self.vmem_limit = _vmem_limit_bytes(
            self.TQ, self.KA, self.KRp, hidden,
            jnp.dtype(interp_dtype).itemsize, cap)

        # Exact integer-derived identity sampling grid, (2, Npad) f32.
        idx = jnp.arange(self.Npad, dtype=jnp.int32)
        r = (idx // W).astype(jnp.float32)
        c = (idx % W).astype(jnp.float32)
        self.grid_base = jnp.stack([r, c], axis=0)

        # TODO(synk): the real NIL conv stem is not specified in the reference
        # file; it is synthesized here as a pointwise 2-layer MLP scaled by
        # flow_multiplier (deterministic parameters).
        key = jax.random.PRNGKey(seed)
        self.raw_params = []
        self.packed_params = []
        for _ in range(n_cascades):
            key, k1, k2, k3, k4 = jax.random.split(key, 5)
            w1 = jax.random.normal(k1, (2, hidden), jnp.float32) * 0.5
            b1 = jax.random.normal(k2, (hidden,), jnp.float32) * 0.1
            w2 = jax.random.normal(k3, (hidden, 2), jnp.float32) * 0.5
            b2 = jax.random.normal(k4, (2,), jnp.float32) * 0.1
            self.raw_params.append((w1, b1, w2, b2))
            self.packed_params.append(_pack_stem_params(w1, b1, w2, b2, hidden))

    def _pack_planes(self, x, dtype):
        """x: (B, C, H, W) -> (B, C*KRp, KA) warp source (dtype cast hoisted here)."""
        B, C, H, W = x.shape
        if self.swap:
            x = jnp.swapaxes(x, 2, 3)               # (B, C, W, H); contract over H
            pad = self.KRp - W
        else:
            pad = self.KRp - H
        if pad:
            x = jnp.pad(x, ((0, 0), (0, 0), (0, pad), (0, 0)))
        return x.reshape(B, C * self.KRp, self.KA).astype(dtype)

    def __call__(self, fixed, moving, **kwargs):
        # fixed, moving: NCHW (B, 1, H, W) — PyTorch convention.
        H, W = self.im_size
        N, Npad = self.N, self.Npad
        B = fixed.shape[0]

        def lanes(x):
            x = x.astype(jnp.float32).reshape(B, 1, N)
            if Npad != N:
                x = jnp.pad(x, ((0, 0), (0, 0), (0, Npad - N)))
            return x

        fixed_l = lanes(fixed)
        moving_l = lanes(moving)
        # Moving-image warp source: packed + cast to bf16 ONCE (hoisted).
        mov_src = self._pack_planes(moving.astype(jnp.float32).reshape(B, 1, H, W),
                                    self.interp_dtype)

        prev_warped = moving_l
        prev_agg_src = None
        stem_results = []
        # TODO(synk): optional cross-cascade fusion (keep warped/agg VMEM-resident
        # across cascades) is not implemented; each cascade round-trips via HBM.
        for i in range(self.n_cascades):
            # TODO(synk): affine 'W' einsum branch is unreachable for NIL stems; not implemented.
            flow_i, agg_i, warped_i = cascade_forward(
                self.packed_params[i], self.grid_base, fixed_l, prev_warped,
                prev_agg_src, mov_src, H=H, W=W, KA=self.KA, KRp=self.KRp,
                swap=self.swap, TQ=self.TQ, flow_mult=self.flow_mult,
                vmem_limit=self.vmem_limit, first=(i == 0))
            stem_results.append({"flow": flow_i, "agg_flow": agg_i, "warped": warped_i})
            prev_warped = warped_i
            # Accumulated flow stays f32 for the next cascade's warp source
            # (avoids compounding bf16 displacement quantization).
            prev_agg_src = self._pack_planes(
                agg_i[:, :, :N].reshape(B, 2, H, W), jnp.float32)

        def to_nchw(x):
            return x[:, :, :N].reshape(B, x.shape[1], H, W)

        stem_results = [{k: to_nchw(v) for k, v in r.items()} for r in stem_results]
        flows = [r["agg_flow"] for r in stem_results]
        rcn_hyper = {"det": self.det_factor, "ortho": self.ortho_factor,
                     "reg": self.reg_factor}
        return flows, stem_results, rcn_hyper


# -----------------------------------------------------------------------------
# Pure-JAX (XLA) reference of the same forward pass, for validation.
# -----------------------------------------------------------------------------
def _ref_stem(raw, xf, xm, flow_mult):
    w1, b1, w2, b2 = raw
    h = jnp.maximum(xf[..., None] * w1[0] + xm[..., None] * w1[1] + b1, 0.0)
    f0 = (jnp.sum(h * w2[:, 0], axis=-1) + b2[0]) * flow_mult
    f1 = (jnp.sum(h * w2[:, 1], axis=-1) + b2[1]) * flow_mult
    return f0, f1


def _ref_warp(src, d_h, d_w, H, W):
    B, C = src.shape[0], src.shape[1]
    N = H * W
    rr = (jnp.arange(N) // W).astype(jnp.float32)[None]
    cc = (jnp.arange(N) % W).astype(jnp.float32)[None]
    xs = jnp.clip(rr + d_h, 0.0, H - 1.0)
    ys = jnp.clip(cc + d_w, 0.0, W - 1.0)
    x0 = jnp.floor(xs); x1 = jnp.minimum(x0 + 1.0, H - 1.0); wx = xs - x0
    y0 = jnp.floor(ys); y1 = jnp.minimum(y0 + 1.0, W - 1.0); wy = ys - y0
    flat = src.reshape(B, C, N)

    def gather(xi, yi):
        idx = (xi * W + yi).astype(jnp.int32)
        idx = jnp.broadcast_to(idx[:, None, :], (B, C, N))
        return jnp.take_along_axis(flat, idx, axis=2)

    wxe, wye = wx[:, None, :], wy[:, None, :]
    top = (1.0 - wye) * gather(x0, y0) + wye * gather(x0, y1)
    bot = (1.0 - wye) * gather(x1, y0) + wye * gather(x1, y1)
    return (1.0 - wxe) * top + wxe * bot


def _reference_forward(model, fixed, moving):
    H, W = model.im_size
    B = fixed.shape[0]
    N = H * W
    xf = fixed.astype(jnp.float32).reshape(B, N)
    xm = moving.astype(jnp.float32).reshape(B, N)
    mov_src = moving.astype(jnp.float32).reshape(B, 1, H, W)

    prev_warped = xm
    prev_agg = jnp.zeros((B, 2, H, W), jnp.float32)
    out = []
    for i, raw in enumerate(model.raw_params):
        fh, fw = _ref_stem(raw, xf, prev_warped, model.flow_mult)
        if i == 0:
            agg_h, agg_w = fh, fw
        else:
            wa = _ref_warp(prev_agg, fh, fw, H, W)
            agg_h = wa[:, 0, :] + fh
            agg_w = wa[:, 1, :] + fw
        wm = _ref_warp(mov_src, agg_h, agg_w, H, W)[:, 0, :]
        out.append({
            "flow": jnp.stack([fh, fw], axis=1).reshape(B, 2, H, W),
            "agg_flow": jnp.stack([agg_h, agg_w], axis=1).reshape(B, 2, H, W),
            "warped": wm.reshape(B, 1, H, W),
        })
        prev_warped = wm
        prev_agg = out[-1]["agg_flow"]
    return out


if __name__ == "__main__":
    def run_case(B, H, W, n_casc, seed):
        kf, km = jax.random.split(jax.random.PRNGKey(seed))
        fixed = jax.random.uniform(kf, (B, 1, H, W), dtype=jnp.float32)
        moving = jax.random.uniform(km, (B, 1, H, W), dtype=jnp.float32)

        model = RecursiveCascadeNetwork(n_cascades=n_casc, im_size=(H, W),
                                        network="NIL")
        flows, stem_results, hyper = model(fixed, moving)
        jax.block_until_ready(flows)
        jax.block_until_ready(stem_results)

        assert len(flows) == n_casc and flows[0].shape == (B, 2, H, W)
        assert stem_results[0]["warped"].shape == (B, 1, H, W)
        assert hyper == {"det": 0.1, "ortho": 0.1, "reg": 1.0}

        ref = _reference_forward(model, fixed, moving)

        # Cascade 0: stem is pure f32 pointwise work -> tight check; agg == flow
        # exactly; warped_0 goes through one bf16-weighted interpolation.
        assert jnp.allclose(stem_results[0]["flow"], ref[0]["flow"],
                            atol=5e-4, rtol=1e-3)
        assert jnp.allclose(stem_results[0]["agg_flow"], stem_results[0]["flow"],
                            atol=1e-6)
        assert jnp.allclose(stem_results[0]["warped"], ref[0]["warped"], atol=3e-2)

        # Deeper cascades: flow-field warps stay f32, only the image warp is
        # bf16 -> robust mean-abs metric (an indexing bug would be >> 1e-1).
        for got, want in zip(stem_results, ref):
            for k in ("flow", "agg_flow", "warped"):
                assert bool(jnp.all(jnp.isfinite(got[k]))), k
                mad = float(jnp.mean(jnp.abs(got[k] - want[k])))
                assert mad < 2e-2, (k, mad)

    # Square image (column-contraction path), B=2, 3 cascades.
    run_case(B=2, H=16, W=16, n_casc=3, seed=0)
    # Tall image H > W (contraction-axis swap path), B=1, 2 cascades.
    run_case(B=1, H=24, W=16, n_casc=2, seed=1)

    print("KERNEL_OK")
</pallas_src>

<mosaic_0001>
module attributes {stable_mosaic.version = 11 : i64} {
  func.func @_cascade_kernel_first(%arg0: i32, %arg1: i32, %arg2: memref<32x8xf32, #tpu.memory_space<vmem>>, %arg3: memref<2x256xf32, #tpu.memory_space<vmem>>, %arg4: memref<1x1x256xf32, #tpu.memory_space<vmem>>, %arg5: memref<1x1x256xf32, #tpu.memory_space<vmem>>, %arg6: memref<1x16x16xbf16, #tpu.memory_space<vmem>>, %arg7: memref<1x2x256xf32, #tpu.memory_space<vmem>>, %arg8: memref<1x2x256xf32, #tpu.memory_space<vmem>>, %arg9: memref<1x1x256xf32, #tpu.memory_space<vmem>>) attributes {dimension_semantics = [#tpu.dimension_semantics<parallel>, #tpu.dimension_semantics<parallel>], iteration_bounds = array<i64: 2, 1>, scalar_prefetch = 0 : i64, scratch_operands = 0 : i64, tpu.core_type = #tpu.core_type<tc>, window_params = [{pipeline_mode = #tpu.pipeline_mode<synchronous>, transform_indices = @transform_0, window_bounds = array<i64: 32, 8>}, {transform_indices = @transform_1, window_bounds = array<i64: 2, 256>}, {transform_indices = @transform_2, window_bounds = array<i64: 1, 1, 256>}, {transform_indices = @transform_3, window_bounds = array<i64: 1, 1, 256>}, {transform_indices = @transform_4, window_bounds = array<i64: 1, 16, 16>}, {transform_indices = @transform_5, window_bounds = array<i64: 1, 2, 256>}, {transform_indices = @transform_6, window_bounds = array<i64: 1, 2, 256>}, {transform_indices = @transform_7, window_bounds = array<i64: 1, 1, 256>}]} {
    %c0 = arith.constant 0 : index
    %c0_0 = arith.constant 0 : index
    %c0_1 = arith.constant 0 : index
    %0 = vector.load %arg4[%c0, %c0_0, %c0_1] : memref<1x1x256xf32, #tpu.memory_space<vmem>>, vector<1x1x256xf32>
    %1 = vector.shape_cast %0 : vector<1x1x256xf32> to vector<1x256xf32>
    %c0_2 = arith.constant 0 : index
    %c0_3 = arith.constant 0 : index
    %c0_4 = arith.constant 0 : index
    %2 = vector.load %arg5[%c0_2, %c0_3, %c0_4] : memref<1x1x256xf32, #tpu.memory_space<vmem>>, vector<1x1x256xf32>
    %3 = vector.shape_cast %2 : vector<1x1x256xf32> to vector<1x256xf32>
    %c0_5 = arith.constant 0 : index
    %c0_6 = arith.constant 0 : index
    %4 = vector.load %arg2[%c0_5, %c0_6] : memref<32x8xf32, #tpu.memory_space<vmem>>, vector<32x8xf32>
    %5 = vector.extract_strided_slice %4 {offsets = [0, 0], sizes = [32, 1], strides = [1, 1]} : vector<32x8xf32> to vector<32x1xf32>
    %6 = vector.extract_strided_slice %4 {offsets = [0, 1], sizes = [32, 1], strides = [1, 1]} : vector<32x8xf32> to vector<32x1xf32>
    %7 = vector.extract_strided_slice %4 {offsets = [0, 2], sizes = [32, 1], strides = [1, 1]} : vector<32x8xf32> to vector<32x1xf32>
    %8 = vector.extract_strided_slice %4 {offsets = [0, 3], sizes = [32, 1], strides = [1, 1]} : vector<32x8xf32> to vector<32x1xf32>
    %9 = vector.extract_strided_slice %4 {offsets = [0, 4], sizes = [32, 1], strides = [1, 1]} : vector<32x8xf32> to vector<32x1xf32>
    %10 = vector.extract_strided_slice %4 {offsets = [0, 5], sizes = [1, 1], strides = [1, 1]} : vector<32x8xf32> to vector<1x1xf32>
    %11 = vector.extract_strided_slice %4 {offsets = [0, 6], sizes = [1, 1], strides = [1, 1]} : vector<32x8xf32> to vector<1x1xf32>
    %12 = vector.broadcast %5 : vector<32x1xf32> to vector<32x256xf32>
    %13 = vector.broadcast %1 : vector<1x256xf32> to vector<32x256xf32>
    %14 = arith.mulf %12, %13 : vector<32x256xf32>
    %15 = vector.broadcast %6 : vector<32x1xf32> to vector<32x256xf32>
    %16 = vector.broadcast %3 : vector<1x256xf32> to vector<32x256xf32>
    %17 = arith.mulf %15, %16 : vector<32x256xf32>
    %18 = arith.addf %14, %17 : vector<32x256xf32>
    %19 = vector.broadcast %7 : vector<32x1xf32> to vector<32x256xf32>
    %20 = arith.addf %18, %19 : vector<32x256xf32>
    %cst = arith.constant 0.000000e+00 : f32
    %21 = vector.broadcast %cst : f32 to vector<32x256xf32>
    %22 = arith.maximumf %20, %21 : vector<32x256xf32>
    %23 = vector.broadcast %8 : vector<32x1xf32> to vector<32x256xf32>
    %24 = arith.mulf %23, %22 : vector<32x256xf32>
    %cst_7 = arith.constant dense<0.000000e+00> : vector<256xf32>
    %25 = vector.multi_reduction <add>, %24, %cst_7 [0] : vector<32x256xf32> to vector<256xf32>
    %26 = vector.shape_cast %25 : vector<256xf32> to vector<1x256xf32>
    %27 = vector.broadcast %10 : vector<1x1xf32> to vector<1x256xf32>
    %28 = arith.addf %26, %27 : vector<1x256xf32>
    %cst_8 = arith.constant 0.333333343 : f32
    %29 = vector.broadcast %cst_8 : f32 to vector<1x256xf32>
    %30 = arith.mulf %28, %29 : vector<1x256xf32>
    %31 = vector.broadcast %9 : vector<32x1xf32> to vector<32x256xf32>
    %32 = arith.mulf %31, %22 : vector<32x256xf32>
    %cst_9 = arith.constant dense<0.000000e+00> : vector<256xf32>
    %33 = vector.multi_reduction <add>, %32, %cst_9 [0] : vector<32x256xf32> to vector<256xf32>
    %34 = vector.shape_cast %33 : vector<256xf32> to vector<1x256xf32>
    %35 = vector.broadcast %11 : vector<1x1xf32> to vector<1x256xf32>
    %36 = arith.addf %34, %35 : vector<1x256xf32>
    %cst_10 = arith.constant 0.333333343 : f32
    %37 = vector.broadcast %cst_10 : f32 to vector<1x256xf32>
    %38 = arith.mulf %36, %37 : vector<1x256xf32>
    %c0_11 = arith.constant 0 : index
    %c0_12 = arith.constant 0 : index
    %39 = vector.load %arg3[%c0_11, %c0_12] : memref<2x256xf32, #tpu.memory_space<vmem>>, vector<1x256xf32>
    %c1 = arith.constant 1 : index
    %c0_13 = arith.constant 0 : index
    %40 = vector.load %arg3[%c1, %c0_13] : memref<2x256xf32, #tpu.memory_space<vmem>>, vector<1x256xf32>
    %41 = arith.addf %39, %30 : vector<1x256xf32>
    %cst_14 = arith.constant 0.000000e+00 : f32
    %cst_15 = arith.constant 1.500000e+01 : f32
    %42 = vector.broadcast %cst_14 : f32 to vector<1x256xf32>
    %43 = arith.maximumf %42, %41 : vector<1x256xf32>
    %44 = vector.broadcast %cst_15 : f32 to vector<1x256xf32>
    %45 = arith.minimumf %44, %43 : vector<1x256xf32>
    %46 = arith.addf %40, %38 : vector<1x256xf32>
    %cst_16 = arith.constant 0.000000e+00 : f32
    %cst_17 = arith.constant 1.500000e+01 : f32
    %47 = vector.broadcast %cst_16 : f32 to vector<1x256xf32>
    %48 = arith.maximumf %47, %46 : vector<1x256xf32>
    %49 = vector.broadcast %cst_17 : f32 to vector<1x256xf32>
    %50 = arith.minimumf %49, %48 : vector<1x256xf32>
    %c0_18 = arith.constant 0 : index
    %c0_19 = arith.constant 0 : index
    %c0_20 = arith.constant 0 : index
    %51 = vector.load %arg6[%c0_18, %c0_19, %c0_20] : memref<1x16x16xbf16, #tpu.memory_space<vmem>>, vector<1x16x16xbf16>
    %52 = vector.shape_cast %51 : vector<1x16x16xbf16> to vector<16x16xbf16>
    %53 = tpu.iota {dimensions = array<i32: 0>} : vector<16x256xi32>
    %54 = arith.sitofp %53 : vector<16x256xi32> to vector<16x256xf32>
    %55 = vector.broadcast %50 : vector<1x256xf32> to vector<16x256xf32>
    %56 = arith.subf %54, %55 : vector<16x256xf32>
    %57 = math.absf %56 : vector<16x256xf32>
    %cst_21 = arith.constant 1.000000e+00 : f32
    %58 = vector.broadcast %cst_21 : f32 to vector<16x256xf32>
    %59 = arith.subf %58, %57 : vector<16x256xf32>
    %cst_22 = arith.constant 0.000000e+00 : f32
    %60 = vector.broadcast %cst_22 : f32 to vector<16x256xf32>
    %61 = arith.maximumf %59, %60 : vector<16x256xf32>
    %62 = arith.truncf %61 : vector<16x256xf32> to vector<16x256xbf16>
    %cst_23 = arith.constant dense<0.000000e+00> : vector<16x256xf32>
    %63 = tpu.matmul %52, %62, %cst_23 {dimension_numbers = #tpu.dot_dimension_numbers<[1], [0], [0], [1], [0, 0, 1, 1], [], []>} : vector<16x16xbf16>, vector<16x256xbf16>, vector<16x256xf32> -> vector<16x256xf32>
    %64 = tpu.iota {dimensions = array<i32: 0>} : vector<16x256xi32>
    %65 = arith.sitofp %64 : vector<16x256xi32> to vector<16x256xf32>
    %66 = vector.broadcast %45 : vector<1x256xf32> to vector<16x256xf32>
    %67 = arith.subf %65, %66 : vector<16x256xf32>
    %68 = math.absf %67 : vector<16x256xf32>
    %cst_24 = arith.constant 1.000000e+00 : f32
    %69 = vector.broadcast %cst_24 : f32 to vector<16x256xf32>
    %70 = arith.subf %69, %68 : vector<16x256xf32>
    %cst_25 = arith.constant 0.000000e+00 : f32
    %71 = vector.broadcast %cst_25 : f32 to vector<16x256xf32>
    %72 = arith.maximumf %70, %71 : vector<16x256xf32>
    %73 = arith.mulf %72, %63 : vector<16x256xf32>
    %cst_26 = arith.constant dense<0.000000e+00> : vector<256xf32>
    %74 = vector.multi_reduction <add>, %73, %cst_26 [0] : vector<16x256xf32> to vector<256xf32>
    %75 = vector.shape_cast %74 : vector<256xf32> to vector<1x256xf32>
    %76 = tpu.concatenate %30, %38 in 0 : vector<1x256xf32>, vector<1x256xf32> -> vector<2x256xf32>
    %c0_27 = arith.constant 0 : index
    %c0_28 = arith.constant 0 : index
    %c0_29 = arith.constant 0 : index
    %77 = vector.load %arg7[%c0_27, %c0_28, %c0_29] : memref<1x2x256xf32, #tpu.memory_space<vmem>>, vector<1x2x256xf32>
    %78 = vector.shape_cast %77 : vector<1x2x256xf32> to vector<2x256xf32>
    %79 = vector.shape_cast %76 : vector<2x256xf32> to vector<1x2x256xf32>
    tpu.vector_store %arg7[%c0_27, %c0_28, %c0_29], %79 {strides = array<i32>} : memref<1x2x256xf32, #tpu.memory_space<vmem>>, vector<1x2x256xf32>,
    %80 = tpu.concatenate %30, %38 in 0 : vector<1x256xf32>, vector<1x256xf32> -> vector<2x256xf32>
    %c0_30 = arith.constant 0 : index
    %c0_31 = arith.constant 0 : index
    %c0_32 = arith.constant 0 : index
    %81 = vector.load %arg8[%c0_30, %c0_31, %c0_32] : memref<1x2x256xf32, #tpu.memory_space<vmem>>, vector<1x2x256xf32>
    %82 = vector.shape_cast %81 : vector<1x2x256xf32> to vector<2x256xf32>
    %83 = vector.shape_cast %80 : vector<2x256xf32> to vector<1x2x256xf32>
    tpu.vector_store %arg8[%c0_30, %c0_31, %c0_32], %83 {strides = array<i32>} : memref<1x2x256xf32, #tpu.memory_space<vmem>>, vector<1x2x256xf32>,
    %c0_33 = arith.constant 0 : index
    %c0_34 = arith.constant 0 : index
    %c0_35 = arith.constant 0 : index
    %84 = vector.load %arg9[%c0_33, %c0_34, %c0_35] : memref<1x1x256xf32, #tpu.memory_space<vmem>>, vector<1x1x256xf32>
    %85 = vector.shape_cast %84 : vector<1x1x256xf32> to vector<1x256xf32>
    %86 = vector.shape_cast %75 : vector<1x256xf32> to vector<1x1x256xf32>
    tpu.vector_store %arg9[%c0_33, %c0_34, %c0_35], %86 {strides = array<i32>} : memref<1x1x256xf32, #tpu.memory_space<vmem>>, vector<1x1x256xf32>,
    return
  }
  func.func @transform_0(%arg0: i32, %arg1: i32) -> (i32, i32) {
    %c0_i32 = arith.constant 0 : i32
    %c0_i32_0 = arith.constant 0 : i32
    %c0_i32_1 = arith.constant 0 : i32
    return %c0_i32, %c0_i32_0 : i32, i32
  }
  func.func @transform_1(%arg0: i32, %arg1: i32) -> (i32, i32) {
    %c0_i32 = arith.constant 0 : i32
    %c0_i32_0 = arith.constant 0 : i32
    return %c0_i32, %arg1 : i32, i32
  }
  func.func @transform_2(%arg0: i32, %arg1: i32) -> (i32, i32, i32) {
    %c0_i32 = arith.constant 0 : i32
    %c0_i32_0 = arith.constant 0 : i32
    return %arg0, %c0_i32, %arg1 : i32, i32, i32
  }
  func.func @transform_3(%arg0: i32, %arg1: i32) -> (i32, i32, i32) {
    %c0_i32 = arith.constant 0 : i32
    %c0_i32_0 = arith.constant 0 : i32
    return %arg0, %c0_i32, %arg1 : i32, i32, i32
  }
  func.func @transform_4(%arg0: i32, %arg1: i32) -> (i32, i32, i32) {
    %c0_i32 = arith.constant 0 : i32
    %c0_i32_0 = arith.constant 0 : i32
    %c0_i32_1 = arith.constant 0 : i32
    return %arg0, %c0_i32, %c0_i32_0 : i32, i32, i32
  }
  func.func @transform_5(%arg0: i32, %arg1: i32) -> (i32, i32, i32) {
    %c0_i32 = arith.constant 0 : i32
    %c0_i32_0 = arith.constant 0 : i32
    return %arg0, %c0_i32, %arg1 : i32, i32, i32
  }
  func.func @transform_6(%arg0: i32, %arg1: i32) -> (i32, i32, i32) {
    %c0_i32 = arith.constant 0 : i32
    %c0_i32_0 = arith.constant 0 : i32
    return %arg0, %c0_i32, %arg1 : i32, i32, i32
  }
  func.func @transform_7(%arg0: i32, %arg1: i32) -> (i32, i32, i32) {
    %c0_i32 = arith.constant 0 : i32
    %c0_i32_0 = arith.constant 0 : i32
    return %arg0, %c0_i32, %arg1 : i32, i32, i32
  }
}

</mosaic_0001>

<bundles_post_ra>
// kernel: tpu_custom_call.1
= control target key start
LH: loop header
LB: loop body
LE: loop exit
PB: predicated region body
PF: predicated region fallthrough
CT: control target
= control target key end

     0   :  { %s1669_s0 = inlined_call_operand.vmem [shape: f32[32,8], index: 0, kind: input, shape index: {}]   ;;  %s1670_s1 = inlined_call_operand.vmem [shape: f32[2,256], index: 1, kind: input, shape index: {}]   ;;  %s1671_s2 = inlined_call_operand.vmem [shape: f32[2,1,256], index: 2, kind: input, shape index: {}]   ;;  %s1672_s3 = inlined_call_operand.vmem [shape: f32[2,1,256], index: 3, kind: input, shape index: {}]   ;;  %s1673_s4 = inlined_call_operand.vmem [shape: bf16[2,16,16], index: 4, kind: input, shape index: {}]   ;;  %s1674_s5 = inlined_call_operand.hbm [shape: f32[2,2,256], index: 5, kind: output, shape index: {0}]   ;;  %s1675_s6 = inlined_call_operand.hbm [shape: f32[2,2,256], index: 6, kind: output, shape index: {1}]   ;;  %s1676_s7 = inlined_call_operand.hbm [shape: f32[2,1,256], index: 7, kind: output, shape index: {2}]  }
   0x1   :  { %1678 = sst [smem:[#allocation9_spill]] %s1669_s0 }
   0x2   :  { %13 = vsyncpa [#allocation3], 0 }
   0x3   :  { %15 = vsyncpa [#allocation3 + $0x1], 0 }
   0x4   :  { %16 = vsyncpa [#allocation5], 0 }
   0x5   :  { %18 = vsyncpa [#allocation5 + $0x1], 0  ;;  %s1396_s24 = smov 0   ;;  %s1398_s25 = smov 0  }
   0x6   :  { %s1400_s26 = smov 0   ;;  %s1402_s27 = smov 0  }
   0x7   :  { %s1404_s28 = smov 0   ;;  %s1406_s29 = smov 0  }
   0x8 LB: > { %s1087_s30 = sadd.s32 4294967295, %s1343_s29   ;;  %s1677_s8 = sadd.s32 4294967294, %s1343_s29   ;;  %s1343_s29 = sphi %s1406_s29, %s24_s29   ;;  %s1339_s28 = sphi %s1404_s28, %s1689_s28   ;;  %s1335_s27 = sphi %s1402_s27, %s1688_s27   ;;  %s1331_s26 = sphi %s1400_s26, %s1687_s26   ;;  %s1327_s25 = sphi %s1398_s25, %s1686_s25   ;;  %s1323_s24 = sphi %s1396_s24, %s1685_s24  }
   0x9   : > { %s36_s9 = sadd.s32 1, %s1339_s28  ;;  %s174_s10 = sadd.s32 1, %s1331_s26 }
   0xa   : > { %p38_p0 = scmp.ge.s32.totalorder %s36_s9, 2  ;;  %p184_p1 = scmp.ne.s32.totalorder %s1331_s26, %s1327_s25 }
   0xb   : > { %p185_p2 = scmp.eq.s32.totalorder %s1087_s30, 1  ;;  %p190_p3 = scmp.ne.s32.totalorder %s1327_s25, %s1323_s24 }
   0xc   : > { %s1691_s9 = smov (%p38_p0, %s36_s9), 0  ;;  %p191_p5 = scmp.eq.s32.totalorder %s1677_s8, 1 }
   0xd   : > { %p1438_p4 = por %p185_p2, %p184_p1  ;;  %s169_s12 = ssub.s32 %s1339_s28, %s1691_s9 }
   0xe   : > { %p1092_p6 = scmp.ge.s32.totalorder %s1343_s29, 1  ;;  %p172_p7 = scmp.eq.s32.totalorder %s169_s12, 0 }
   0xf   : > { %p1447_p8 = por %p191_p5, %p190_p3  ;;  %p309_p9 = scmp.lt.s32.totalorder %s1343_s29, 3 }
  0x10   : > { %s1453_s14 = scalar_select %p172_p7, %s1331_s26, %s174_s10  }
  0x11   : > { %p310_p10 = pnand %p1092_p6, %p309_p9 }
  0x12   : > { %s1681_s0 = sld [smem:[#allocation9_spill]] (!%p310_p10)  ;;  %v1345_v1 = vmov (!%p310_p10), 1   ;;  %v1346_v2 = vmov (!%p310_p10), 0   ;;  %v1347_v6 = vmov (!%p310_p10), 2   ;;  %v1348_v7 = vmov (!%p310_p10), 4   ;;  %p379_p11 = scmp.lt.s32.totalorder (!%p310_p10), %s1335_s27, 1 }
  0x13   : > { %313 = sbr.rel (%p310_p10) target bundleno = 487 (0x1e7), region = 40  ;;  %1194 = vset.pattern.permute.xlu1 (!%p310_p10), %v1345_v1  ;;  %1193 = vset.pattern.permute.xlu0 (!%p310_p10), %v1346_v2  ;;  %v1349_v8 = vmov (!%p310_p10), 6   ;;  %v1350_v9 = vmov (!%p310_p10), 3   ;;  %v1351_v10 = vmov (!%p310_p10), 5   ;;  %v432_v11 = vlaneseq (!%p310_p10)  ;;  %s1353_s21 = smov (!%p310_p10), [#allocation4]  }
  0x14   : > { %747 = vmatprep.mubr.bf16.mxu0 (!%p310_p10), %v1346_v2  ;;  %vm807_vm0 = vcmask (!%p310_p10), 1040384   ;;  %vm711_vm1 = vcmask (!%p310_p10), 130048   ;;  %s1209_s22 = sshll.u32 (!%p310_p10), %s1353_s21, 4  ;;  %s1210_s22 = int_to_ptr.vmem [resolvable:$false] %s1209_s22 }
  0x15   : > { %v1475_v14 = vshrl.u32 (!%p310_p10), %v432_v11, 7 }
  0x17   : > { %v1484_v17 = vsub.s32 (!%p310_p10), 0, %v1475_v14  ;;  %v1487_v18 = vsub.s32 (!%p310_p10), 1, %v1475_v14 }
  0x18   : > { %v407_v0 = vld [vmem:[%s1681_s0] sm:$0xff] (!%p310_p10)  ;;  %v408_v3 = vld [vmem:[%s1681_s0 + $0x8] sm:$0xff] (!%p310_p10)  ;;  %v409_v4 = vld [vmem:[%s1681_s0 + $0x10] sm:$0xff] (!%p310_p10) }
  0x19   : > { %451 = vperm.xlu1 (!%p310_p10), %1194, %v407_v0   ;;  %413 = vperm.xlu0 (!%p310_p10), %1193, %v407_v0   ;;  %v410_v5 = vld [vmem:[%s1681_s0 + $0x18] sm:$0xff] (!%p310_p10) }
  0x1a   : > { %s380_s23 = scalar_select %p379_p11, %s1335_s27, 1 }
  0x1c   : > { %s1116_s10 = sshll.u32 %s380_s23, 3  ;;  %s1096_s17 = sshll.u32 %s380_s23, 1 }
  0x1d   : > { %455 = vperm.xlu1 %1194, %v408_v3   ;;  %418 = vperm.xlu0 %1193, %v408_v3   ;;  %s1472_s16 = scalar_lea.vmem %s1673_s4, %s1116_s10  ;;  %s394_s20 = scalar_lea.vmem %s1672_s3, %s1096_s17 }
  0x1e   : > { %s385_s8 = scalar_lea.vmem %s1671_s2, %s1096_s17  ;;  %v406_v19 = vld [vmem:[%s394_s20] sm:$0x3]  ;;  %s1503_s10 = sand.u32 1, %s1327_s25  }
  0x1f   : > { %v405_v20 = vld [vmem:[%s385_s8] sm:$0x3]  ;;  %v470_v23 = vrot.slane %v406_v19, %v1484_v17  ;;  %v474_v24 = vrot.slane %v406_v19, %v1487_v18  ;;  %s1093_s12 = sshll.u32 %s1503_s10, 2  ;;  %s1117_s20 = sshll.u32 %s1335_s27, 6 }
  0x20   : > { %v435_v25 = vrot.slane %v405_v20, %v1484_v17  ;;  %v439_v26 = vrot.slane %v405_v20, %v1487_v18  ;;  %s1522_s18 = scalar_lea.vmem [#allocation4], %s1093_s12  ;;  %s1525_s19 = scalar_lea.vmem [#allocation2], %s1093_s12 }
  0x21   : > { %459 = vperm.xlu1 %1194, %v409_v4   ;;  %423 = vperm.xlu0 %1193, %v409_v4   ;;  %s1551_s8 = scalar_lea.hbm %s1675_s6, %s1117_s20  ;;  %s889_s23 = sshll.u32 %s1522_s18, 4  ;;  %s1554_s23 = int_to_ptr.vmem [resolvable:$true] %s889_s23 }
  0x22   : > { %s1559_s17 = scalar_lea.hbm %s1674_s5, %s1117_s20  ;;  %s1205_s0 = scalar_lea.vmem %s1554_s23, 64 }
  0x23   : > { %p1206_p12 = scmp.ne.s32.totalorder %s1554_s23, %s1205_s0  ;;  %p1212_p1 = scmp.lt.s32.totalorder %s1554_s23, %s1210_s22 }
  0x25   : > { %463 = vperm.xlu1 %1194, %v410_v5   ;;  %428 = vperm.xlu0 %1193, %v410_v5   ;;  %p1207_p13 = pnand %p1206_p12, %p1438_p4 }
  0x27   : > { %p1208_p0 = pneg %p1207_p13 }
  0x29   : > { %1196 = vset.pattern.permute.xlu1 %v1347_v6  ;;  %1195 = vset.pattern.permute.xlu0 %v1347_v6 }
  0x2a   : > { %498 = vperm.xlu1 %1196, %v408_v3   ;;  %494 = vperm.xlu0 %1195, %v407_v0  }
  0x2e   : > { %502 = vperm.xlu1 %1196, %v409_v4   ;;  %506 = vperm.xlu0 %1195, %v410_v5  }
  0x32   : > { %1197 = vset.pattern.permute.xlu1 %v1348_v7  ;;  %1198 = vset.pattern.permute.xlu0 %v1348_v7 }
  0x33   : > { %576 = vperm.xlu1 %1197, %v407_v0   ;;  %580 = vperm.xlu0 %1198, %v408_v3  }
  0x37   : > { %584 = vperm.xlu1 %1197, %v409_v4   ;;  %1199 = vset.pattern.permute.xlu0 %v1349_v8 }
  0x38   : > { %618 = vperm.xlu0 %1199, %v407_v0  }
  0x3b   : > { %588 = vperm.xlu1 %1197, %v410_v5  }
  0x3c   : > { %1201 = vset.pattern.permute.xlu0 %v1350_v9 }
  0x3d   : > { %534 = vperm.xlu0 %1201, %v409_v4  }
  0x3f   : > { %1200 = vset.pattern.permute.xlu1 %v1350_v9 }
  0x40   : > { %526 = vperm.xlu1 %1200, %v407_v0  }
  0x41   : > { %1203 = vset.pattern.permute.xlu0 %v1349_v8 }
  0x44   : > { %530 = vperm.xlu1 %1200, %v408_v3  }
  0x48   : > { %538 = vperm.xlu1 %1200, %v410_v5  }
  0x4c   : > { %1202 = vset.pattern.permute.xlu1 %v1351_v10 }
  0x4d   : > { %568 = vperm.xlu1 %1202, %v407_v0  }
  0x98   : > { %v452_v12 = vpop.permute.xlu1 %451  ;;  %v414_v13 = vpop.permute.xlu0 %413 }
  0x99   : > { %v477_v29 = vmul.f32 %v470_v23, %v452_v12  ;;  %v478_v30 = vmul.f32 %v474_v24, %v452_v12  ;;  %v442_v31 = vmul.f32 %v435_v25, %v414_v13  ;;  %v443_v32 = vmul.f32 %v439_v26, %v414_v13 }
  0x9b   : > { %v485_v43 = vadd.f32 %v477_v29, %v442_v31  ;;  %v486_v44 = vadd.f32 %v478_v30, %v443_v32 }
  0x9c   : > { %v456_v15 = vpop.permute.xlu1 %455  ;;  %v419_v16 = vpop.permute.xlu0 %418 }
  0x9d   : > { %v479_v33 = vmul.f32 %v470_v23, %v456_v15  ;;  %v480_v34 = vmul.f32 %v474_v24, %v456_v15  ;;  %v444_v35 = vmul.f32 %v435_v25, %v419_v16  ;;  %v445_v36 = vmul.f32 %v439_v26, %v419_v16 }
  0x9f   : > { %v487_v45 = vadd.f32 %v479_v33, %v444_v35  ;;  %v488_v46 = vadd.f32 %v480_v34, %v445_v36 }
  0xa0   : > { %v460_v21 = vpop.permute.xlu1 %459  ;;  %v424_v22 = vpop.permute.xlu0 %423 }
  0xa1   : > { %v481_v37 = vmul.f32 %v470_v23, %v460_v21  ;;  %v482_v38 = vmul.f32 %v474_v24, %v460_v21  ;;  %v446_v39 = vmul.f32 %v435_v25, %v424_v22  ;;  %v447_v40 = vmul.f32 %v439_v26, %v424_v22 }
  0xa3   : > { %v489_v48 = vadd.f32 %v481_v37, %v446_v39  ;;  %v490_v49 = vadd.f32 %v482_v38, %v447_v40 }
  0xa4   : > { %v464_v27 = vpop.permute.xlu1 %463  ;;  %v429_v28 = vpop.permute.xlu0 %428 }
  0xa5   : > { %v483_v51 = vmul.f32 %v470_v23, %v464_v27  ;;  %v484_v52 = vmul.f32 %v474_v24, %v464_v27  ;;  %v448_v53 = vmul.f32 %v435_v25, %v429_v28  ;;  %v449_v54 = vmul.f32 %v439_v26, %v429_v28 }
  0xa7   : > { %v491_v61 = vadd.f32 %v483_v51, %v448_v53  ;;  %v492_v62 = vadd.f32 %v484_v52, %v449_v54 }
  0xa9   : > { %v499_v41 = vpop.permute.xlu1 %498  ;;  %v495_v42 = vpop.permute.xlu0 %494 }
  0xaa   : > { %v511_v55 = vadd.f32 %v499_v41, %v487_v45  ;;  %v512_v56 = vadd.f32 %v499_v41, %v488_v46  ;;  %v509_v57 = vadd.f32 %v495_v42, %v485_v43  ;;  %v510_v58 = vadd.f32 %v495_v42, %v486_v44 }
  0xac   : > { %v519_v1 = vmax.f32 %v511_v55, 0.0  ;;  %v520_v2 = vmax.f32 %v512_v56, 0.0  ;;  %v517_v3 = vmax.f32 %v509_v57, 0.0  ;;  %v518_v4 = vmax.f32 %v510_v58, 0.0 }
  0xad   : > { %v503_v47 = vpop.permute.xlu1 %502  ;;  %v507_v50 = vpop.permute.xlu0 %506 }
  0xae   : > { %v513_v59 = vadd.f32 %v503_v47, %v489_v48  ;;  %v514_v60 = vadd.f32 %v503_v47, %v490_v49  ;;  %v515_v7 = vadd.f32 %v507_v50, %v491_v61  ;;  %v516_v8 = vadd.f32 %v507_v50, %v492_v62 }
  0xaf   : > { %v1352_v47 = vmov 1966171168  }
  0xb0   : > { %v521_v5 = vmax.f32 %v513_v59, 0.0  ;;  %v522_v6 = vmax.f32 %v514_v60, 0.0  ;;  %v523_v20 = vmax.f32 %v515_v7, 0.0  ;;  %v524_v21 = vmax.f32 %v516_v8, 0.0 }
  0xb1   : > { %v632_v48 = vunpack.c.l.s4 %v1352_v47 }
  0xb2   : > { %v577_v63 = vpop.permute.xlu1 %576  ;;  %v581_v0 = vpop.permute.xlu0 %580 }
  0xb3   : > { %v591_v9 = vmul.f32 %v577_v63, %v517_v3  ;;  %v592_v10 = vmul.f32 %v577_v63, %v518_v4  ;;  %v593_v12 = vmul.f32 %v581_v0, %v519_v1  ;;  %v594_v13 = vmul.f32 %v581_v0, %v520_v2 }
  0xb4   : > { %v633_v62 = vunpack.c.0.s8 %v632_v48  ;;  %v625_v48 = vld [vmem:[%s1670_s1] ss:$2 sm:$0x3] }
  0xb5   : > { %v599_v22 = vadd.f32 %v593_v12, %v591_v9  ;;  %v608_v23 = vadd.f32 %v594_v13, %v592_v10 }
  0xb6   : > { %v585_v15 = vpop.permute.xlu1 %584 }
  0xb7   : > { %v595_v16 = vmul.f32 %v585_v15, %v521_v5  ;;  %v596_v19 = vmul.f32 %v585_v15, %v522_v6  ;;  %v619_v29 = vpop.permute.xlu0 %618 }
  0xb9   : > { %v600_v25 = vadd.f32 %v599_v22, %v595_v16  ;;  %v609_v26 = vadd.f32 %v608_v23, %v596_v19 }
  0xba   : > { %v589_v24 = vpop.permute.xlu1 %588 }
  0xbb   : > { %v597_v27 = vmul.f32 %v589_v24, %v523_v20  ;;  %v598_v28 = vmul.f32 %v589_v24, %v524_v21 }
  0xbc   : > { %v535_v39 = vpop.permute.xlu0 %534 }
  0xbd   : > { %v601_v30 = vadd.f32 %v600_v25, %v597_v27  ;;  %v610_v31 = vadd.f32 %v609_v26, %v598_v28  ;;  %v545_v49 = vmul.f32 %v535_v39, %v521_v5  ;;  %v546_v50 = vmul.f32 %v535_v39, %v522_v6 }
  0xbe   : > { %v1494_v5 = vsub.s32 %v633_v62, %v1475_v14  ;;  %v674_v26 = vadd.s32 8, %v1475_v14 }
  0xbf   : > { %v602_v32 = vrot.slane %v601_v30, 4  ;;  %v611_v33 = vrot.slane %v610_v31, 4  ;;  %v527_v34 = vpop.permute.xlu1 %526 }
  0xc0   : > { %v541_v41 = vmul.f32 %v527_v34, %v517_v3  ;;  %v542_v42 = vmul.f32 %v527_v34, %v518_v4  ;;  %v1508_v34 = vcvt.s32.f32 %v674_v26 }
  0xc1   : > { %v603_v35 = vadd.f32 %v602_v32, %v601_v30  ;;  %v612_v36 = vadd.f32 %v611_v33, %v610_v31  ;;  %v1506_v33 = vcvt.s32.f32 %v1475_v14 }
  0xc3   : > { %v604_v37 = vrot.slane %v603_v35, 2  ;;  %v613_v38 = vrot.slane %v612_v36, 2  ;;  %v531_v40 = vpop.permute.xlu1 %530 }
  0xc4   : > { %v543_v43 = vmul.f32 %v531_v40, %v519_v1  ;;  %v544_v44 = vmul.f32 %v531_v40, %v520_v2 }
  0xc5   : > { %v605_v45 = vadd.f32 %v604_v37, %v603_v35  ;;  %v614_v46 = vadd.f32 %v613_v38, %v612_v36 }
  0xc6   : > { %v549_v51 = vadd.f32 %v543_v43, %v541_v41  ;;  %v558_v52 = vadd.f32 %v544_v44, %v542_v42 }
  0xc7   : > { %v606_v53 = vrot.slane %v605_v45, 1  ;;  %v615_v54 = vrot.slane %v614_v46, 1  ;;  %v539_v55 = vpop.permute.xlu1 %538 }
  0xc8   : > { %v547_v56 = vmul.f32 %v539_v55, %v523_v20  ;;  %v548_v57 = vmul.f32 %v539_v55, %v524_v21  ;;  %v550_v58 = vadd.f32 %v549_v51, %v545_v49  ;;  %v559_v59 = vadd.f32 %v558_v52, %v546_v50  ;;  %v1100_v20 = vld [vmem:[%s1670_s1 + $0x1] ss:$2 sm:$0x3] }
  0xc9   : > { %v607_v60 = vadd.f32 %v606_v53, %v605_v45  ;;  %v616_v61 = vadd.f32 %v615_v54, %v614_v46 }
  0xca   : > { %v551_v63 = vadd.f32 %v550_v58, %v547_v56  ;;  %v560_v0 = vadd.f32 %v559_v59, %v548_v57 }
  0xcb   : > { %v621_v1 = vadd.f32 %v619_v29, %v607_v60  ;;  %v622_v2 = vadd.f32 %v619_v29, %v616_v61 }
  0xcc   : > { %v552_v3 = vrot.slane %v551_v63, 4  ;;  %v561_v4 = vrot.slane %v560_v0, 4  ;;  %v569_v24 = vpop.permute.xlu1 %568 }
  0xcd   : > { %v623_v6 = vmul.f32 0.33333334, %v621_v1  ;;  %v624_v7 = vmul.f32 0.33333334, %v622_v2 }
  0xce   : > { %v553_v8 = vadd.f32 %v552_v3, %v551_v63  ;;  %v562_v9 = vadd.f32 %v561_v4, %v560_v0  ;;  %v1204_v4 = vld [vmem:[%s1472_s16] sm:$0xff]   ;;  %s1545_s16 = sand.u32 1, %s1087_s30  }
  0xcf   : > { %v651_v10 = vcombine.low %v623_v6, %v624_v7  ;;  %v803_v37 = vrot.slane %v623_v6, 7  ;;  %v804_v38 = vrot.slane %v624_v7, 7 }
  0xd0   : > { %v554_v12 = vrot.slane %v553_v8, 2  ;;  %v563_v13 = vrot.slane %v562_v9, 2 }
  0xd1   : > { %v658_v15 = vrot.slane %v651_v10, %v1494_v5 }
  0xd2   : > { %v555_v16 = vadd.f32 %v554_v12, %v553_v8  ;;  %v564_v19 = vadd.f32 %v563_v13, %v562_v9 }
  0xd3   : > { %v665_v21 = vrot.slane %v658_v15, %v1494_v5 }
  0xd4   : > { %v556_v22 = vrot.slane %v555_v16, 1  ;;  %v565_v23 = vrot.slane %v564_v19, 1 }
  0xd5   : > { %v667_v25 = vadd.f32 %v1100_v20, %v665_v21 }
  0xd6   : > { %v557_v27 = vadd.f32 %v556_v22, %v555_v16  ;;  %v566_v28 = vadd.f32 %v565_v23, %v564_v19 }
  0xd7   : > { %v668_v29 = vmax.f32 %v667_v25, 0.0 }
  0xd8   : > { %v571_v30 = vadd.f32 %v569_v24, %v557_v27  ;;  %v572_v31 = vadd.f32 %v569_v24, %v566_v28 }
  0xd9   : > { %v669_v32 = vmin.f32 %v668_v29, 15.0 }
  0xda   : > { %v573_v35 = vmul.f32 0.33333334, %v571_v30  ;;  %v574_v36 = vmul.f32 0.33333334, %v572_v31 }
  0xdb   : > { %v685_v39 = vrot.slane %v669_v32, %v1487_v18  ;;  %v681_v40 = vrot.slane %v669_v32, %v1484_v17 }
  0xdc   : > { %v630_v41 = vcombine.low %v573_v35, %v574_v36  ;;  %v808_v42 = vsel %vm807_vm0, %v573_v35, %v803_v37  ;;  %v809_v43 = vsel %vm807_vm0, %v574_v36, %v804_v38 }
  0xdd   : > { %v689_v44 = vsub.f32 %v1506_v33, %v685_v39  ;;  %v691_v45 = vsub.f32 %v1508_v34, %v685_v39  ;;  %v688_v14 = vsub.f32 %v1506_v33, %v681_v40  ;;  %v690_v46 = vsub.f32 %v1508_v34, %v681_v40 }
  0xde   : > { %v637_v47 = vrot.slane %v630_v41, %v1494_v5  ;;  %v812_v49 = vcombine.low %v808_v42, %v809_v43 }
  0xdf   : > { %v693_v50 = vand.u32 2147483647, %v689_v44  ;;  %v695_v51 = vand.u32 2147483647, %v691_v45  ;;  %v692_v52 = vand.u32 2147483647, %v688_v14 }
  0xe0   : > { %v644_v53 = vrot.slane %v637_v47, %v1494_v5  ;;  %v694_v54 = vand.u32 2147483647, %v690_v46  ;;  %1104 = vst.sshfl [vmem:[%s1522_s18] sm:$0x33 pattern:$0x76325410] %v812_v49  ;;  %s1211_s18 = scalar_lea.vmem %s1210_s22, 128 }
  0xe1   : > { %1103 = vst.sshfl [vmem:[%s1525_s19] sm:$0x33 pattern:$0x76325410] %v812_v49  ;;  %v697_v55 = vsub.f32 1.0, %v693_v50  ;;  %v699_v56 = vsub.f32 1.0, %v695_v51  ;;  %v696_v57 = vsub.f32 1.0, %v692_v52  ;;  %p1213_p2 = scmp.lt.s32.totalorder %s1211_s18, %s1205_s0 }
  0xe2   : > { %v698_v58 = vsub.f32 1.0, %v694_v54  ;;  %v646_v59 = vadd.f32 %v644_v53, %v625_v48 }
  0xe3   : > { %v701_v60 = vmax.f32 %v697_v55, 0.0  ;;  %v703_v61 = vmax.f32 %v699_v56, 0.0  ;;  %v700_v62 = vmax.f32 %v696_v57, 0.0  ;;  %p1214_p3 = por %p1213_p2, %p1212_p1 }
  0xe4   : > { %v702_v63 = vmax.f32 %v698_v58, 0.0  ;;  %v647_v0 = vmax.f32 %v646_v59, 0.0 }
  0xe5   : > { %v705_v1 = vpack.c.bf16 %v703_v61, %v701_v60  ;;  %p1215_p5 = pnand %p1214_p3, %p1208_p0 }
  0xe6   : > { %v704_v2 = vpack.c.bf16 %v702_v63, %v700_v62  ;;  %v648_v3 = vmin.f32 %v647_v0, 15.0 }
  0xe7   : > { %715 = vmatprep.subr.bf16.mxu0 %v705_v1 }
  0xe8   : > { %716 = vmatpush1.bf16.msra.mxu0 %v704_v2  ;;  %v1530_v6 = vrot.slane %v648_v3, %v1484_v17  ;;  %v1533_v7 = vrot.slane %v648_v3, %v1487_v18 }
  0xea   : > { %v769_v8 = vsub.f32 %v1506_v33, %v1530_v6  ;;  %v770_v9 = vsub.f32 %v1506_v33, %v1533_v7  ;;  %v771_v10 = vsub.f32 %v1508_v34, %v1530_v6  ;;  %v772_v12 = vsub.f32 %v1508_v34, %v1533_v7 }
  0xeb   : > { %1102 = vmatmul.mubr.msk.bf16.vlgmr.msra.gmra.mrb[0].mxu0 %vm711_vm1, %v1204_v4 }
  0xec   : > { %1218 = shalt.err (!%p1215_p5)
}
  0xed   : > { %s1219_s20 = scalar_lea.hbm %s1551_s8, 64  ;;  %s1223_s21 = scalar_lea.hbm %s1675_s6, 128 }
  0xee   : > { %p1220_p6 = scmp.ne.s32.totalorder %s1551_s8, %s1219_s20  ;;  %p1224_p10 = scmp.lt.u32.totalorder %s1551_s8, %s1675_s6 }
  0xef   : > { %p1225_p11 = scmp.lt.u32.totalorder %s1223_s21, %s1219_s20  ;;  %p1227_p13 = scmp.lt.u32.totalorder %s1219_s20, %s1551_s8 }
  0xf0   : > { %p1221_p7 = pnand %p1220_p6, %p1438_p4 }
  0xf1   : > { %p1226_p12 = por %p1225_p11, %p1224_p10 }
  0xf2   : > { %p1222_p9 = pneg %p1221_p7 }
  0xf3   : > { %p1228_p0 = por %p1227_p13, %p1226_p12 }
  0xf5   : > { %p1229_p1 = pnand %p1228_p0, %p1222_p9 }
  0xf7   : > { %1232 = shalt.err (!%p1229_p1)
}
  0xf8   : > { %s1682_s0 = scalar_lea.sflag [#allocation5], %s1545_s16  ;;  %s873_s18 = sshll.u32 %s1525_s19, 4  ;;  %s874_s18 = int_to_ptr.vmem [resolvable:$true] %s873_s18 }
  0xf9   : > { %1121 = dma.vmem_to_hbm [thread:$0]  (%p1438_p4), %s1554_s23, 64, %s1551_s8, %s1682_s0  }
  0xfa   : > { %s847_s30 = scalar_lea.sflag [#allocation3], %s1503_s10  ;;  %s1233_s12 = scalar_lea.vmem %s874_s18, 64 }
  0xfb   : > { %p1234_p2 = scmp.ne.s32.totalorder %s874_s18, %s1233_s12  ;;  %s1354_s20 = smov [#allocation2]  }
  0xfc   : > { %s1237_s15 = sshll.u32 %s1354_s20, 4  ;;  %s1238_s15 = int_to_ptr.vmem [resolvable:$false] %s1237_s15 }
  0xfd   : > { %p1235_p3 = pnand %p1234_p2, %p1438_p4  ;;  %s1239_s21 = scalar_lea.vmem %s1238_s15, 128 }
  0xfe   : > { %p1240_p6 = scmp.lt.s32.totalorder %s874_s18, %s1238_s15  ;;  %p1241_p7 = scmp.lt.s32.totalorder %s1239_s21, %s1233_s12 }
  0xff   : > { %p1236_p5 = pneg %p1235_p3 }
 0x100   : > { %p1242_p9 = por %p1241_p7, %p1240_p6 }
 0x102   : > { %p1243_p10 = pnand %p1242_p9, %p1236_p5 }
 0x104   : > { %1246 = shalt.err (!%p1243_p10)
}
 0x105   : > { %s1247_s19 = scalar_lea.hbm %s1559_s17, 64  ;;  %s1251_s22 = scalar_lea.hbm %s1674_s5, 128 }
 0x106   : > { %p1248_p11 = scmp.ne.s32.totalorder %s1559_s17, %s1247_s19  ;;  %p1252_p0 = scmp.lt.u32.totalorder %s1559_s17, %s1674_s5 }
 0x107   : > { %p1253_p1 = scmp.lt.u32.totalorder %s1251_s22, %s1247_s19  ;;  %p1255_p3 = scmp.lt.u32.totalorder %s1247_s19, %s1559_s17 }
 0x108   : > { %p1249_p12 = pnand %p1248_p11, %p1438_p4 }
 0x109   : > { %p1254_p2 = por %p1253_p1, %p1252_p0 }
 0x10a   : > { %p1250_p13 = pneg %p1249_p12 }
 0x10b   : > { %p1256_p5 = por %p1255_p3, %p1254_p2 }
 0x10d   : > { %p1257_p6 = pnand %p1256_p5, %p1250_p13 }
 0x10f   : > { %1260 = shalt.err (!%p1257_p6)
}
 0x110   : > { %1120 = dma.vmem_to_hbm [thread:$0]  (%p1438_p4), %s874_s18, 64, %s1559_s17, %s847_s30   ;;  %v773_v17 = vand.u32 2147483647, %v769_v8  ;;  %v774_v18 = vand.u32 2147483647, %v770_v9  ;;  %vm843_vm2 = vcmp.lt.s32.totalorder %v432_v11, 256 }
 0x111   : > { %v775_v13 = vand.u32 2147483647, %v771_v10  ;;  %v776_v15 = vand.u32 2147483647, %v772_v12  ;;  %s1095_s17 = sshll.u32 %s1503_s10, 1  ;;  %s1119_s18 = sshll.u32 %s1335_s27, 5 }
 0x112   : > { %v777_v16 = vsub.f32 1.0, %v773_v17  ;;  %v778_v19 = vsub.f32 1.0, %v774_v18  ;;  %s371_s30 = scalar_lea.vmem [#allocation6], %s1095_s17  ;;  %s1624_s19 = scalar_lea.hbm %s1676_s7, %s1119_s18 }
 0x113   : > { %v779_v20 = vsub.f32 1.0, %v775_v13  ;;  %v780_v21 = vsub.f32 1.0, %v776_v15  ;;  %s905_s12 = sshll.u32 %s371_s30, 4  ;;  %s1355_s27 = smov [#allocation6]   ;;  %s906_s12 = int_to_ptr.vmem [resolvable:$true] %s905_s12 }
 0x114   : > { %v781_v22 = vmax.f32 %v777_v16, 0.0  ;;  %v782_v24 = vmax.f32 %v778_v19, 0.0  ;;  %s1261_s10 = scalar_lea.vmem %s906_s12, 32  ;;  %s1265_s8 = sshll.u32 %s1355_s27, 4  ;;  %s1266_s8 = int_to_ptr.vmem [resolvable:$false] %s1265_s8 }
 0x115   : > { %v783_v27 = vmax.f32 %v779_v20, 0.0  ;;  %v784_v30 = vmax.f32 %v780_v21, 0.0  ;;  %p1262_p7 = scmp.ne.s32.totalorder %s906_s12, %s1261_s10  ;;  %s1267_s23 = scalar_lea.vmem %s1266_s8, 64 }
 0x116   : > { %p1268_p11 = scmp.lt.s32.totalorder %s906_s12, %s1266_s8  ;;  %p1269_p12 = scmp.lt.s32.totalorder %s1267_s23, %s1261_s10 }
 0x117   : > { %p1263_p9 = pnand %p1262_p7, %p1438_p4 }
 0x118   : > { %p1270_p13 = por %p1269_p12, %p1268_p11 }
 0x119   : > { %p1264_p10 = pneg %p1263_p9 }
 0x11b   : > { %p1271_p0 = pnand %p1270_p13, %p1264_p10 }
 0x1be   : > { %v749_v23 = vpop.f32.mrb[0].mxu0 }
 0x1bf   : > { %v785_v25 = vmul.f32 %v781_v22, %v749_v23  ;;  %v751_v26 = vpop.f32.mrb[1].mxu0 }
 0x1c0   : > { %v786_v28 = vmul.f32 %v782_v24, %v751_v26  ;;  %v753_v29 = vpop.f32.mrb[2].mxu0 }
 0x1c1   : > { %v787_v31 = vmul.f32 %v783_v27, %v753_v29  ;;  %v755_v32 = vpop.f32.mrb[3].mxu0 }
 0x1c2   : > { %v788_v33 = vmul.f32 %v784_v30, %v755_v32 }
 0x1c3   : > { %v789_v35 = vadd.f32 %v787_v31, %v785_v25 }
 0x1c4   : > { %v796_v34 = vadd.f32 %v788_v33, %v786_v28 }
 0x1c5   : > { %v790_v36 = vrot.slane %v789_v35, 4 }
 0x1c6   : > { %v797_v37 = vrot.slane %v796_v34, 4 }
 0x1c7   : > { %v791_v38 = vadd.f32 %v790_v36, %v789_v35 }
 0x1c8   : > { %v798_v39 = vadd.f32 %v797_v37, %v796_v34 }
 0x1c9   : > { %v792_v40 = vrot.slane %v791_v38, 2 }
 0x1ca   : > { %v799_v41 = vrot.slane %v798_v39, 2 }
 0x1cb   : > { %v793_v42 = vadd.f32 %v792_v40, %v791_v38 }
 0x1cc   : > { %v800_v43 = vadd.f32 %v799_v41, %v798_v39 }
 0x1cd   : > { %v794_v44 = vrot.slane %v793_v42, 1 }
 0x1ce   : > { %v801_v45 = vrot.slane %v800_v43, 1 }
 0x1cf   : > { %v795_v14 = vadd.f32 %v794_v44, %v793_v42 }
 0x1d0   : > { %v802_v46 = vadd.f32 %v801_v45, %v800_v43 }
 0x1d2   : > { %v825_v47 = vcombine.low %v795_v14, %v802_v46 }
 0x1d4   : > { %v832_v48 = vrot.slane %v825_v47, %v1494_v5 }
 0x1d6   : > { %v839_v49 = vrot.slane %v832_v48, %v1494_v5 }
 0x1d8   : > { %845 = vst.msk [vmem:[%s371_s30] sm:$0x3] %vm843_vm2, %v839_v49 }
 0x1d9   : > { %1274 = shalt.err (!%p1271_p0)
}
 0x1da   : > { %s1275_s22 = scalar_lea.hbm %s1624_s19, 32  ;;  %s1279_s17 = scalar_lea.hbm %s1676_s7, 64 }
 0x1db   : > { %p1276_p1 = scmp.ne.s32.totalorder %s1624_s19, %s1275_s22  ;;  %p1280_p5 = scmp.lt.u32.totalorder %s1624_s19, %s1676_s7 }
 0x1dc   : > { %p1281_p6 = scmp.lt.u32.totalorder %s1279_s17, %s1275_s22  ;;  %p1283_p9 = scmp.lt.u32.totalorder %s1275_s22, %s1624_s19 }
 0x1dd   : > { %p1277_p2 = pnand %p1276_p1, %p1438_p4 }
 0x1de   : > { %p1282_p7 = por %p1281_p6, %p1280_p5 }
 0x1df   : > { %p1278_p3 = pneg %p1277_p2 }
 0x1e0   : > { %p1284_p10 = por %p1283_p9, %p1282_p7 }
 0x1e2   : > { %p1285_p11 = pnand %p1284_p10, %p1278_p3 }
 0x1e4   : > { %1288 = shalt.err (!%p1285_p11)
}
 0x1e5   : > { %s1683_s15 = scalar_lea.sflag [#allocation5], %s1545_s16 }
 0x1e6   : > { %1122 = dma.vmem_to_hbm [thread:$0]  (%p1438_p4), %s906_s12, 32, %s1624_s19, %s1683_s15  }
 0x1e7 PF: > { %p1136_p12 = scmp.ge.s32.totalorder %s1343_s29, 2  ;;  %s917_s21 = sand.u32 1, %s1323_s24  }
 0x1e8   : > { %s918_s10 = scalar_lea.sflag [#allocation3], %s917_s21 }
 0x1e9   : > { %p1127_p13 = pnand %p1136_p12, %p1447_p8 }
 0x1eb   : > { %1314 = dma.done.wait (!%p1127_p13), %s918_s10, 64  }
 0x1ec   : > { %1316 = vsyncadd (!%p1127_p13), %s918_s10, 4294967232  ;;  %s1684_s27 = sadd.s32 4294967294, %s1343_s29  }
 0x1ed   : > { %s926_s8 = sand.u32 1, %s1684_s27  }
 0x1ee   : > { %s927_s23 = scalar_lea.sflag [#allocation5], %s926_s8 }
 0x1ef   : > { %1318 = dma.done.wait (!%p1127_p13), %s927_s23, 96  }
 0x1f0   : > { %1320 = vsyncadd (!%p1127_p13), %s927_s23, 4294967200  ;;  %s24_s29 = sadd.s32 1, %s1343_s29   ;;  %s1685_s24 = smov %s1327_s25 }
 0x1f1   : > { %p21_p4 = scmp.ge.s32.totalorder %s24_s29, 4   ;;  %s1686_s25 = smov %s1331_s26 }
 0x1f2   : > { %s1687_s26 = smov %s1453_s14  ;;  %s1688_s27 = smov %s1339_s28 }
 0x1f3   : > { %s1689_s28 = smov %s1691_s9  ;;  %23 = sbr.rel (!%p21_p4) target bundleno = 8 (0x8), region = 117 }
 0x1fa   :  { %941 = vsyncpa [#allocation3], 1 }
 0x1fb   :  { %943 = vsyncpa [#allocation3 + $0x1], 1 }
 0x1fc   :  { %944 = vsyncpa [#allocation5], 1 }
 0x1fd   :  { %946 = vsyncpa [#allocation5 + $0x1], 1 }

</bundles_post_ra>
